<compile_context>
chip_gen: v5e
topology: v5e:2x2
jax: 0.10.0
libtpu: 0.0.40
codegen_flags: <defaults>
</compile_context>

<pallas_src>
import functools

import jax
import jax.numpy as jnp
from jax import lax
from jax.experimental import pallas as pl
from jax.experimental.pallas import tpu as pltpu


# ---------------------------------------------------------------------------
# Kernels
# ---------------------------------------------------------------------------
def _mean_linear_kernel(x_ref, w_ref, b_ref, o_ref, *, inv_len):
    """Full-L variant: one grid step handles TB batch rows.

    x_ref : [TB, L, D]  word embeddings (any float dtype; accumulated in f32)
    w_ref : [D, D]      nn.Linear weight, (out, in) layout -- NOT transposed
    b_ref : [1, D]      bias
    o_ref : [TB, D]     f32 output slab (sublane/lane dense)
    """
    x = x_ref[...].astype(jnp.float32)              # cast after load (bf16 -> f32 acc)
    mean_x = jnp.sum(x, axis=1) * inv_len           # [TB, D], f32 accumulation
    y = lax.dot_general(                            # mean_x @ W.T on the MXU
        mean_x, w_ref[...],
        dimension_numbers=(((1,), (1,)), ((), ())),
        preferred_element_type=jnp.float32)
    o_ref[...] = (y + b_ref[...]).astype(o_ref.dtype)


def _mean_linear_kernel_ltiled(x_ref, w_ref, b_ref, o_ref, acc_ref, *, inv_len):
    """L-tiled variant (P3 accumulator): grid = (batch blocks, L blocks).

    x_ref : [TB, TL, D], acc_ref : [TB, D] f32 scratch, o_ref : [TB, D].
    """
    l = pl.program_id(1)

    @pl.when(l == 0)
    def _():
        acc_ref[...] = jnp.zeros_like(acc_ref)

    x = x_ref[...].astype(jnp.float32)              # [TB, TL, D]
    acc_ref[...] += jnp.sum(x, axis=1)              # partial sum over this L tile

    @pl.when(l == pl.num_programs(1) - 1)
    def _():
        mean_x = acc_ref[...] * inv_len             # f32 mean over full L
        y = lax.dot_general(
            mean_x, w_ref[...],
            dimension_numbers=(((1,), (1,)), ((), ())),
            preferred_element_type=jnp.float32)
        o_ref[...] = (y + b_ref[...]).astype(o_ref.dtype)


# ---------------------------------------------------------------------------
# Tile planning
# ---------------------------------------------------------------------------
def _vmem_capacity_bytes():
    """Physical VMEM of the attached TPU; conservative 64 MiB (v7x) fallback."""
    try:
        return int(pltpu.get_tpu_info().vmem_capacity_bytes)
    except Exception:
        return 64 * 1024 * 1024


def _plan_tiles(B, L, D, x_itemsize, vmem_limit, tb=None, tl=None):
    """Pick (tb, tl) from a VMEM budget. Returns None -> caller falls back to XLA."""
    # Fixed VMEM: W + bias blocks (double-buffered by the default pipeline;
    # see TODO(synk) about pipeline_mode=pl.Buffered(1)) plus 1 MiB slack.
    fixed = 2 * (D * D + D) * 4 + (1 << 20)
    avail = vmem_limit - fixed
    if avail <= 0:
        return None

    def rows_that_fit(tl_):
        # per batch row: 2x x block (double-buffered, input dtype)
        #              + 2x out block (double-buffered, f32) + f32 accumulator
        per_row = 2 * tl_ * D * x_itemsize + 2 * D * 4 + D * 4
        return avail // per_row

    target_x_block = 8 * 1024 * 1024     # past the measured HBM-roofline knee
    min_rows = min(B, 8)

    if tl is None:
        if rows_that_fit(L) >= min_rows:
            tl = L                        # no L tiling needed
        else:
            cands = [t for t in range(8, L, 8)
                     if L % t == 0 and rows_that_fit(t) >= min_rows]
            if not cands:
                # TODO(synk): masked partial-L accumulation for L with no
                # multiple-of-8 divisor that fits VMEM.
                return None
            tl = max(cands)
    else:
        if tl != L and (tl % 8 != 0 or L % tl != 0):
            raise ValueError("tl must equal L or be a multiple of 8 dividing L")
        if rows_that_fit(tl) < min_rows:
            return None

    if tb is None:
        if B < 8:
            tb = B                        # output block sublane dim must equal B
        else:
            tb = int(min(B, rows_that_fit(tl),
                         max(8, target_x_block // (tl * D * x_itemsize))))
            tb = max(8, (tb // 8) * 8)    # sublane-aligned; ragged last block is OK

    if tb != B and tb % 8 != 0:           # output-block (tb, D) legality
        return None
    return int(tb), int(tl)


# ---------------------------------------------------------------------------
# Wrapper
# ---------------------------------------------------------------------------
def multiply_mean(batch_mwe, mwe_lengths, weight, bias, *,
                  tb=None, tl=None, force_pallas=False):
    """batch_mwe: float[B, L, D], mwe_lengths: i32[B] (unused by the forward),
    weight: f32[D, D] (nn.Linear (out, in) layout), bias: f32[D] -> f32[B, D]."""
    del mwe_lengths  # the reference PyTorch forward ignores the lengths
    B, L, D = batch_mwe.shape
    x_itemsize = jnp.dtype(batch_mwe.dtype).itemsize

    # Small-problem / narrow-D fallback: below the architecture floor XLA's
    # fused mean+GEMM wins and avoids masked vst / <13% MXU lane utilization.
    if not force_pallas and (D < 128 or B * L * D * x_itemsize < 256 * 1024):
        return _reference(batch_mwe.astype(jnp.float32), None,
                          weight.astype(jnp.float32), bias.astype(jnp.float32))

    vmem_cap = _vmem_capacity_bytes()
    vmem_limit = int(min((vmem_cap * 3) // 4, 96 * 1024 * 1024))  # 48 MiB on v7x, 96 MiB on v5e/v6e

    plan = _plan_tiles(B, L, D, x_itemsize, vmem_limit, tb=tb, tl=tl)
    if plan is None:
        return _reference(batch_mwe.astype(jnp.float32), None,
                          weight.astype(jnp.float32), bias.astype(jnp.float32))
    tb, tl = plan

    w = weight.astype(jnp.float32)                 # passed as-is, no transpose
    b2 = bias.reshape(1, D).astype(jnp.float32)
    inv_len = 1.0 / float(L)
    nb = pl.cdiv(B, tb)

    if tl == L:
        kernel = functools.partial(_mean_linear_kernel, inv_len=inv_len)
        grid = (nb,)
        in_specs = [
            pl.BlockSpec((tb, L, D), lambda i: (i, 0, 0)),   # x batch tile
            pl.BlockSpec((D, D),     lambda i: (0, 0)),      # W (constant block)
            pl.BlockSpec((1, D),     lambda i: (0, 0)),      # bias (constant block)
        ]
        out_specs = pl.BlockSpec((tb, D), lambda i: (i, 0))
        scratch_shapes = []
        dim_sem = ("parallel",)
    else:
        kernel = functools.partial(_mean_linear_kernel_ltiled, inv_len=inv_len)
        nl = L // tl
        grid = (nb, nl)
        in_specs = [
            pl.BlockSpec((tb, tl, D), lambda i, l: (i, l, 0)),
            pl.BlockSpec((D, D),      lambda i, l: (0, 0)),
            pl.BlockSpec((1, D),      lambda i, l: (0, 0)),
        ]
        out_specs = pl.BlockSpec((tb, D), lambda i, l: (i, 0))  # resident across L
        scratch_shapes = [pltpu.VMEM((tb, D), jnp.float32)]
        dim_sem = ("parallel", "arbitrary")

    return pl.pallas_call(
        kernel,
        out_shape=jax.ShapeDtypeStruct((B, D), jnp.float32),
        grid_spec=pltpu.PrefetchScalarGridSpec(
            num_scalar_prefetch=0,
            grid=grid,
            in_specs=in_specs,
            out_specs=out_specs,
            scratch_shapes=scratch_shapes,
        ),
        compiler_params=pltpu.CompilerParams(
            dimension_semantics=dim_sem,
            vmem_limit_bytes=vmem_limit,
        ),
    )(batch_mwe, w, b2)


def _reference(batch_mwe, mwe_lengths, weight, bias):
    """Plain-JAX reference matching the PyTorch forward."""
    del mwe_lengths
    mean_x = jnp.mean(batch_mwe, axis=1)           # [B, D]
    return mean_x @ weight.T + bias                # nn.Linear semantics


# ---------------------------------------------------------------------------
# Demo / self-test
# ---------------------------------------------------------------------------
if __name__ == "__main__":
    key = jax.random.PRNGKey(0)
    k1, k2, k3, k4 = jax.random.split(key, 4)

    # --- Demo 1: module-sized problem (B=2, L=8, D=32), eye weight / zero bias
    B, L, D = 2, 8, 32
    x = jax.random.normal(k1, (B, L, D), dtype=jnp.float32)
    lengths = jnp.array([5, 3], dtype=jnp.int32)   # unused by the forward

    w_eye = jnp.eye(D, dtype=jnp.float32)
    b0 = jnp.zeros((D,), dtype=jnp.float32)

    ref = _reference(x, lengths, w_eye, b0)
    out_fallback = jax.block_until_ready(multiply_mean(x, lengths, w_eye, b0))
    out_pallas = jax.block_until_ready(
        multiply_mean(x, lengths, w_eye, b0, force_pallas=True))
    assert out_pallas.shape == (B, D)
    assert jnp.allclose(out_fallback, ref, atol=1e-5, rtol=1e-5)
    assert jnp.allclose(out_pallas, ref, atol=1e-5, rtol=1e-5)

    # Non-trivial weights to exercise the matmul + bias path.
    w_r = jax.random.normal(k2, (D, D), dtype=jnp.float32) * 0.1
    b_r = jax.random.normal(k3, (D,), dtype=jnp.float32) * 0.1
    out2 = jax.block_until_ready(
        multiply_mean(x, lengths, w_r, b_r, force_pallas=True))
    assert jnp.allclose(out2, _reference(x, lengths, w_r, b_r), atol=1e-5, rtol=1e-5)

    # --- Demo 2: bf16 input, multi-block batch grid + L-tiled accumulator path
    B2, L2, D2 = 32, 16, 128
    x2 = jax.random.normal(k4, (B2, L2, D2), dtype=jnp.float32).astype(jnp.bfloat16)
    w2 = jax.random.normal(k2, (D2, D2), dtype=jnp.float32) * 0.05
    b2v = jax.random.normal(k3, (D2,), dtype=jnp.float32) * 0.05
    len2 = jnp.full((B2,), L2, dtype=jnp.int32)

    out3 = jax.block_until_ready(
        multiply_mean(x2, len2, w2, b2v, tb=8, tl=8, force_pallas=True))
    ref3 = _reference(x2.astype(jnp.float32), len2, w2, b2v)
    assert jnp.allclose(out3, ref3, atol=1e-4, rtol=1e-4)

    print("KERNEL_OK")
</pallas_src>

<mosaic_0001>
module attributes {stable_mosaic.version = 11 : i64} {
  func.func @_mean_linear_kernel(%arg0: i32, %arg1: memref<2x8x32xf32, #tpu.memory_space<vmem>>, %arg2: memref<32x32xf32, #tpu.memory_space<vmem>>, %arg3: memref<1x32xf32, #tpu.memory_space<vmem>>, %arg4: memref<2x32xf32, #tpu.memory_space<vmem>>) attributes {dimension_semantics = [#tpu.dimension_semantics<parallel>], iteration_bounds = array<i64: 1>, scalar_prefetch = 0 : i64, scratch_operands = 0 : i64, tpu.core_type = #tpu.core_type<tc>, window_params = [{transform_indices = @transform_0, window_bounds = array<i64: 2, 8, 32>}, {pipeline_mode = #tpu.pipeline_mode<synchronous>, transform_indices = @transform_1, window_bounds = array<i64: 32, 32>}, {pipeline_mode = #tpu.pipeline_mode<synchronous>, transform_indices = @transform_2, window_bounds = array<i64: 1, 32>}, {transform_indices = @transform_3, window_bounds = array<i64: 2, 32>}]} {
    %c0 = arith.constant 0 : index
    %c0_0 = arith.constant 0 : index
    %c0_1 = arith.constant 0 : index
    %0 = vector.load %arg1[%c0, %c0_0, %c0_1] : memref<2x8x32xf32, #tpu.memory_space<vmem>>, vector<2x8x32xf32>
    %cst = arith.constant dense<0.000000e+00> : vector<2x32xf32>
    %1 = vector.multi_reduction <add>, %0, %cst [1] : vector<2x8x32xf32> to vector<2x32xf32>
    %cst_2 = arith.constant 1.250000e-01 : f32
    %2 = vector.broadcast %cst_2 : f32 to vector<2x32xf32>
    %3 = arith.mulf %1, %2 : vector<2x32xf32>
    %c0_3 = arith.constant 0 : index
    %c0_4 = arith.constant 0 : index
    %4 = vector.load %arg2[%c0_3, %c0_4] : memref<32x32xf32, #tpu.memory_space<vmem>>, vector<32x32xf32>
    %cst_5 = arith.constant dense<0.000000e+00> : vector<2x32xf32>
    %5 = tpu.matmul %3, %4, %cst_5 {dimension_numbers = #tpu.dot_dimension_numbers<[1], [1], [0], [0], [0, 0, 1, 0], [], []>} : vector<2x32xf32>, vector<32x32xf32>, vector<2x32xf32> -> vector<2x32xf32>
    %c0_6 = arith.constant 0 : index
    %c0_7 = arith.constant 0 : index
    %6 = vector.load %arg3[%c0_6, %c0_7] : memref<1x32xf32, #tpu.memory_space<vmem>>, vector<1x32xf32>
    %7 = vector.broadcast %6 : vector<1x32xf32> to vector<2x32xf32>
    %8 = arith.addf %5, %7 : vector<2x32xf32>
    %c0_8 = arith.constant 0 : index
    %c0_9 = arith.constant 0 : index
    %9 = vector.load %arg4[%c0_8, %c0_9] : memref<2x32xf32, #tpu.memory_space<vmem>>, vector<2x32xf32>
    tpu.vector_store %arg4[%c0_8, %c0_9], %8 {strides = array<i32>} : memref<2x32xf32, #tpu.memory_space<vmem>>, vector<2x32xf32>,
    return
  }
  func.func @transform_0(%arg0: i32) -> (i32, i32, i32) {
    %c0_i32 = arith.constant 0 : i32
    %c0_i32_0 = arith.constant 0 : i32
    %c0_i32_1 = arith.constant 0 : i32
    return %arg0, %c0_i32, %c0_i32_0 : i32, i32, i32
  }
  func.func @transform_1(%arg0: i32) -> (i32, i32) {
    %c0_i32 = arith.constant 0 : i32
    %c0_i32_0 = arith.constant 0 : i32
    %c0_i32_1 = arith.constant 0 : i32
    return %c0_i32, %c0_i32_0 : i32, i32
  }
  func.func @transform_2(%arg0: i32) -> (i32, i32) {
    %c0_i32 = arith.constant 0 : i32
    %c0_i32_0 = arith.constant 0 : i32
    %c0_i32_1 = arith.constant 0 : i32
    return %c0_i32, %c0_i32_0 : i32, i32
  }
  func.func @transform_3(%arg0: i32) -> (i32, i32) {
    %c0_i32 = arith.constant 0 : i32
    %c0_i32_0 = arith.constant 0 : i32
    return %arg0, %c0_i32 : i32, i32
  }
}

</mosaic_0001>

<bundles_post_ra>
// kernel: tpu_custom_call.1
= control target key start
LH: loop header
LB: loop body
LE: loop exit
PB: predicated region body
PF: predicated region fallthrough
CT: control target
= control target key end

     0   :  { %8 = vsyncpa [#allocation3], 0  ;;  %s265_s0 = inlined_call_operand.hbm [shape: f32[2,8,32], index: 0, kind: input, shape index: {}]   ;;  %s266_s1 = inlined_call_operand.hbm [shape: f32[32,32], index: 1, kind: input, shape index: {}]   ;;  %s267_s2 = inlined_call_operand.vmem [shape: f32[1,32], index: 2, kind: input, shape index: {}]   ;;  %s268_s3 = inlined_call_operand.hbm [shape: f32[2,32], index: 3, kind: output, shape index: {}]  }
   0x1   :  { %9 = vsyncpa [#allocation6], 0 }
   0x2   :  { %10 = vsyncpa [#allocation4], 0  ;;  %s15_s14 = sshll.u32 %s265_s0, 4  ;;  %s221_s15 = smov [#allocation2]   ;;  %s16_s14 = int_to_ptr.hbm [resolvable:$true] %s15_s14 }
   0x3   :  { %s17_s16 = sshll.u32 %s221_s15, 4  ;;  %s28_s19 = sshll.u32 %s266_s1, 4  ;;  %s18_s16 = int_to_ptr.vmem [resolvable:$true] %s17_s16  ;;  %s29_s19 = int_to_ptr.hbm [resolvable:$true] %s28_s19 }
   0x4   :  { %s222_s20 = smov 128   ;;  %s223_s21 = smov 8  }
   0x5   :  { %23 = dma.hbm_to_vmem [thread:$0]  %s16_s14, 256, %s18_s16, [#allocation3], %s222_s20, %s222_s20, %s223_s21  }
   0x6   :  { %s224_s22 = smov [#allocation5]  }
   0x7   :  { %s30_s23 = sshll.u32 %s224_s22, 4  ;;  %s31_s23 = int_to_ptr.vmem [resolvable:$true] %s30_s23 }
   0x8   :  { %36 = dma.hbm_to_vmem [thread:$0]  %s29_s19, 512, %s31_s23, [#allocation6], %s222_s20, %s222_s20, %s223_s21  }
   0x9   :  { %215 = dma.done.wait [#allocation3], 256  }
   0xa   :  { %216 = vsyncadd [#allocation3], 4294967040 }
   0xb   :  { %217 = dma.done.wait [#allocation6], 512  }
   0xc   :  { %218 = vsyncadd [#allocation6], 4294966784  ;;  %vm49_vm0 = vcmask 261120   ;;  %v69_v0 = vld [vmem:[#allocation5 + $0x18] sm:$0xff]  ;;  %v47_v1 = vld [vmem:[#allocation2] sm:$0xff]  ;;  %vm76_vm1 = vcmask 1041409  }
   0xd   :  { %132 = vmatpush.xpose.msk.msra.mxu0 %vm49_vm0, %v69_v0  ;;  %v48_v2 = vld [vmem:[#allocation2 + $0x8] sm:$0xff]  ;;  %v68_v3 = vld [vmem:[#allocation5 + $0x10] sm:$0xff]  ;;  %v50_v4 = vsel %vm49_vm0, %v47_v1, 0.0  ;;  %v67_v10 = vld [vmem:[#allocation5 + $0x8] sm:$0xff]  ;;  %s225_s24 = smov [#allocation7]   ;;  %s121_s28 = sshll.u32 %s268_s3, 4  ;;  %s122_s28 = int_to_ptr.hbm [resolvable:$true] %s121_s28 }
   0xe   :  { %v57_v5 = vsel %vm49_vm0, %v48_v2, 0.0  ;;  %v51_v6 = vrot.slane %v50_v4, 4  ;;  %v66_v15 = vld [vmem:[#allocation5] sm:$0xff]  ;;  %v142_v23 = vld [vmem:[%s267_s2] ss:$0 sm:$0xff]  ;;  %s119_s25 = sshll.u32 %s225_s24, 4  ;;  %s120_s25 = int_to_ptr.vmem [resolvable:$true] %s119_s25 }
   0xf   :  { %v58_v7 = vrot.slane %v57_v5, 4  ;;  %vm112_vm2 = vcmask 254976  }
  0x10   :  { %v52_v8 = vadd.f32 %v51_v6, %v50_v4 }
  0x11   :  { %133 = vmatpush.xpose.msk.msra.mxu0 %vm49_vm0, %v68_v3  ;;  %v59_v9 = vadd.f32 %v58_v7, %v57_v5 }
  0x12   :  { %v53_v11 = vrot.slane %v52_v8, 2 }
  0x13   :  { %v60_v12 = vrot.slane %v59_v9, 2 }
  0x14   :  { %v54_v13 = vadd.f32 %v53_v11, %v52_v8 }
  0x15   :  { %134 = vmatpush.xpose.msk.msra.mxu0 %vm49_vm0, %v67_v10  ;;  %v61_v14 = vadd.f32 %v60_v12, %v59_v9 }
  0x16   :  { %v55_v16 = vrot.slane %v54_v13, 1 }
  0x17   :  { %v62_v17 = vrot.slane %v61_v14, 1 }
  0x18   :  { %v56_v18 = vadd.f32 %v55_v16, %v54_v13 }
  0x19   :  { %135 = vmatpush.xpose.msk.msra.mxu0 %vm49_vm0, %v66_v15  ;;  %v63_v19 = vadd.f32 %v62_v17, %v61_v14 }
  0x1a   :  { %v64_v20 = vmul.f32 0.125, %v56_v18 }
  0x1b   :  { %v65_v21 = vmul.f32 0.125, %v63_v19 }
  0x1d   :  { %v77_v22 = vsel %vm76_vm1, %v65_v21, %v64_v20 }
  0x1e   :  { %136 = vmatmul.msk.f32.vlgmr.msra.gmra.mxu0 %vm49_vm0, %v77_v22 }
  0x9b   :  { %v109_v24 = vpop.f32.mrf.mxu0 }
  0x9c   :  { %v110_v25 = vadd.f32 %v142_v23, %v109_v24 }
  0x9e   :  { %113 = vst.msk [vmem:[#allocation7] sm:$0x3] %vm112_vm2, %v110_v25 }
  0x9f   :  { %124 = dma.vmem_to_hbm [thread:$0]  %s120_s25, 32, %s122_s28, [#allocation4]  }
  0xa0   :  { %219 = dma.done.wait [#allocation4], 32  }
  0xa1   :  { %220 = vsyncadd [#allocation4], 4294967264 }
  0xa2   :  { %129 = vsyncpa [#allocation3], 1 }
  0xa3   :  { %130 = vsyncpa [#allocation6], 1 }
  0xa4   :  { %131 = vsyncpa [#allocation4], 1 }

</bundles_post_ra>
